<compile_context>
chip_gen: v7x
topology: tpu7x:2x2x1
jax: 0.10.0
libtpu: 0.0.40
codegen_flags: <defaults>
</compile_context>

<pallas_src>
import functools

import jax
import jax.numpy as jnp
import numpy as np
from jax import lax
from jax.experimental import pallas as pl
from jax.experimental.pallas import tpu as pltpu

_SUBLANE = 8  # f32 sublane tile; channel-padding target


def _round_up(x, m):
    return (x + m - 1) // m * m


def _pick_batch_pack(n, hw, lane_target):
    """Largest divisor of n not exceeding ceil(lane_target / hw)."""
    nb = min(n, max(1, lane_target // hw))
    while n % nb:
        nb -= 1
    return nb


def _boundary_masks(H2, W2, nb, dtype):
    """(9, 1, nb*H2*W2) validity masks for the 3x3 / pad=1 taps, tiled per image."""
    hw = H2 * W2
    ri, cj = np.divmod(np.arange(hw), W2)
    row_ok = {-1: ri >= 1, 0: np.ones(hw, bool), 1: ri <= H2 - 2}
    col_ok = {-1: cj >= 1, 0: np.ones(hw, bool), 1: cj <= W2 - 2}
    m = np.stack([row_ok[dy] & col_ok[dx]
                  for dy in (-1, 0, 1) for dx in (-1, 0, 1)])
    m = np.tile(m, (1, nb)).astype(np.float32)     # period hw -> seam-safe rolls
    return jnp.asarray(m, dtype).reshape(9, 1, nb * hw)


def _fold_params(wdw, bdw, wpw, bpw, g, be, rm, rv, c_pad, o_pad, eps=1e-5):
    """Fold depthwise weight/bias, pointwise weight/bias and eval-mode BN into a
    single (o_pad, 9*c_pad) matmul weight and an (o_pad, 1) bias."""
    out_c, in_c = wpw.shape[0], wpw.shape[1]
    s = g / jnp.sqrt(rv + eps)                        # BN scale, (O,)
    w_pw = wpw[:, :, 0, 0]                            # (O, Cin)
    dw = wdw[:, 0].reshape(in_c, 9)                   # (Cin, 9), tap = 3*(dy+1)+(dx+1)
    w_big = s[:, None, None] * w_pw[:, None, :] * jnp.transpose(dw)[None]  # (O, 9, Cin)
    w_big = jnp.pad(w_big, ((0, o_pad - out_c), (0, 0), (0, c_pad - in_c)))
    b = s * (w_pw @ bdw + bpw) + (be - rm * s)
    b = jnp.pad(b, (0, o_pad - out_c))
    return w_big.reshape(o_pad, 9 * c_pad), b[:, None].astype(jnp.float32)


def _ds_block(p, masks, w_big, bias, W2):
    """DepthwiseSeparableConv(3x3, pad=1) + folded biases/BN + ReLU.

    p      : (Cp, L)       activations, channel-major, flat spatial on lanes
    masks  : (9, 1, L)     tap validity masks (1.0 / 0.0)
    w_big  : (O, 9*Cp)     depthwise taps folded into the pointwise/BN weight
    bias   : (O, 1)        folded depthwise-bias / pointwise-bias / BN shift
    """
    L = p.shape[-1]
    slabs = []
    t = 0
    for dy in (-1, 0, 1):
        for dx in (-1, 0, 1):
            s = dy * W2 + dx
            if s == 0:
                slabs.append(p)                               # center tap: no roll, no mask
            else:
                shifted = pltpu.roll(p, (-s) % L, axis=1)     # shifted[c,k] = p[c, k+s]
                slabs.append(shifted * masks[t])
            t += 1
    stack = jnp.concatenate(slabs, axis=0)                    # (9*Cp, L), tile-aligned
    y = jnp.dot(w_big, stack, preferred_element_type=jnp.float32)
    return jnp.maximum(y + bias, 0.0).astype(p.dtype)


def downds_kernel(x_ref, m_ref, w1_ref, b1_ref, w2_ref, b2_ref, o_ref,
                  *, W2, compute_dtype):
    # x_ref block: (1, 4, Cp1, L) -- 2x2 pool window on a leading axis.
    xb = x_ref[0].astype(compute_dtype)                       # (4, Cp1, L)
    # MaxPool2d(2): element-wise max of the 4 aligned slabs (VPU only).
    p = jnp.maximum(jnp.maximum(xb[0], xb[1]), jnp.maximum(xb[2], xb[3]))

    masks = m_ref[...].astype(compute_dtype)                  # (9, 1, L), precomputed
    h1 = _ds_block(p, masks, w1_ref[...].astype(compute_dtype), b1_ref[...], W2)
    h2 = _ds_block(h1, masks, w2_ref[...].astype(compute_dtype), b2_ref[...], W2)

    o_ref[0] = h2.astype(o_ref.dtype)


def downds_forward(x_nchw, params, *, compute_dtype=jnp.float32, lane_target=128):
    (wdw1, bdw1, wpw1, bpw1, g1, be1, rm1, rv1,
     wdw2, bdw2, wpw2, bpw2, g2, be2, rm2, rv2) = params

    N, C, H, W = x_nchw.shape
    H2, W2 = H // 2, W // 2
    hw = H2 * W2
    mid = wpw1.shape[0]
    out_c = wpw2.shape[0]

    cp1 = _round_up(C, _SUBLANE)       # padded input channels
    cp2 = _round_up(mid, _SUBLANE)     # padded mid channels

    # NOTE: on v7x (2 TCs) keep >=2 grid steps when the batch allows it; on
    # v5e/v6e fewer, fatter lane-dense steps are strictly better.
    nb = _pick_batch_pack(N, hw, lane_target)
    G = N // nb
    L = nb * hw

    w1_k, b1_k = _fold_params(wdw1, bdw1, wpw1, bpw1, g1, be1, rm1, rv1, cp1, cp2)
    w2_k, b2_k = _fold_params(wdw2, bdw2, wpw2, bpw2, g2, be2, rm2, rv2, cp2, out_c)
    w1_k = w1_k.astype(compute_dtype)
    w2_k = w2_k.astype(compute_dtype)
    masks = _boundary_masks(H2, W2, nb, compute_dtype)

    # Glue: NCHW -> (G, 4, Cp1, L): pool window on a leading axis, nb images
    # packed contiguously along the flat-spatial lane axis, channels padded to 8.
    x = x_nchw[:, :, :H2 * 2, :W2 * 2]                         # MaxPool2d floor for odd H/W
    x = jnp.pad(x, ((0, 0), (0, cp1 - C), (0, 0), (0, 0)))
    xr = x.reshape(G, nb, cp1, H2, 2, W2, 2)
    xr = jnp.transpose(xr, (0, 4, 6, 2, 1, 3, 5))              # (G, 2, 2, Cp1, nb, H2, W2)
    xr = xr.reshape(G, 4, cp1, L)

    kern = functools.partial(downds_kernel, W2=W2, compute_dtype=compute_dtype)

    y = pl.pallas_call(
        kern,
        out_shape=jax.ShapeDtypeStruct((G, out_c, L), x_nchw.dtype),
        grid=(G,),
        in_specs=[
            pl.BlockSpec((1, 4, cp1, L), lambda g: (g, 0, 0, 0)),
            pl.BlockSpec((9, 1, L), lambda g: (0, 0, 0)),
            pl.BlockSpec((cp2, 9 * cp1), lambda g: (0, 0)),
            pl.BlockSpec((cp2, 1), lambda g: (0, 0)),
            pl.BlockSpec((out_c, 9 * cp2), lambda g: (0, 0)),
            pl.BlockSpec((out_c, 1), lambda g: (0, 0)),
        ],
        out_specs=pl.BlockSpec((1, out_c, L), lambda g: (g, 0, 0)),
        compiler_params=pltpu.CompilerParams(
            dimension_semantics=("parallel",),
            # let XLA fuse the pool-window / batch-pack transpose into operand 0
            allow_input_fusion=[True, False, False, False, False, False],
        ),
    )(xr, masks, w1_k, b1_k, w2_k, b2_k)

    # Un-pack: (G, out_c, nb*hw) -> (N, out_c, H2, W2)
    y = y.reshape(G, out_c, nb, H2, W2)
    return jnp.transpose(y, (0, 2, 1, 3, 4)).reshape(N, out_c, H2, W2)


# ---------------- pure-JAX reference (PyTorch semantics, NCHW) ----------------
def downds_reference(x, params):
    (wdw1, bdw1, wpw1, bpw1, g1, be1, rm1, rv1,
     wdw2, bdw2, wpw2, bpw2, g2, be2, rm2, rv2) = params
    eps = 1e-5

    y = lax.reduce_window(x, -jnp.inf, lax.max,
                          (1, 1, 2, 2), (1, 1, 2, 2), 'VALID')

    def ds(y, wdw, bdw, wpw, bpw, g, be, rm, rv):
        c = y.shape[1]
        y = lax.conv_general_dilated(
            y, wdw, (1, 1), ((1, 1), (1, 1)),
            feature_group_count=c,
            dimension_numbers=('NCHW', 'OIHW', 'NCHW'))
        y = y + bdw[None, :, None, None]
        y = lax.conv_general_dilated(
            y, wpw, (1, 1), ((0, 0), (0, 0)),
            dimension_numbers=('NCHW', 'OIHW', 'NCHW'))
        y = y + bpw[None, :, None, None]
        y = (y - rm[None, :, None, None]) / jnp.sqrt(rv[None, :, None, None] + eps)
        y = y * g[None, :, None, None] + be[None, :, None, None]
        return jnp.maximum(y, 0.0)

    y = ds(y, wdw1, bdw1, wpw1, bpw1, g1, be1, rm1, rv1)
    y = ds(y, wdw2, bdw2, wpw2, bpw2, g2, be2, rm2, rv2)
    return y


if __name__ == "__main__":
    # N=4 so that with HW = 8*8 = 64, two images pack onto a 128-lane slab AND
    # the grid keeps 2 parallel steps (both v7x TensorCores busy).
    N, C_in, H, W = 4, 4, 16, 16
    out_ch = 8
    mid = out_ch  # DoubleConvDS: mid_channels defaults to out_channels

    key = jax.random.PRNGKey(0)
    ks = jax.random.split(key, 20)
    f32 = jnp.float32

    # PyTorch-layout parameters (deterministic synthetic init)
    wdw1 = jax.random.normal(ks[0], (C_in, 1, 3, 3), f32) * 0.3
    bdw1 = jax.random.normal(ks[1], (C_in,), f32) * 0.1
    wpw1 = jax.random.normal(ks[2], (mid, C_in, 1, 1), f32) * 0.3
    bpw1 = jax.random.normal(ks[3], (mid,), f32) * 0.1
    g1 = 1.0 + 0.1 * jax.random.normal(ks[4], (mid,), f32)
    be1 = 0.1 * jax.random.normal(ks[5], (mid,), f32)
    rm1 = 0.1 * jax.random.normal(ks[6], (mid,), f32)
    rv1 = jnp.abs(jax.random.normal(ks[7], (mid,), f32)) + 0.5

    wdw2 = jax.random.normal(ks[8], (mid, 1, 3, 3), f32) * 0.3
    bdw2 = jax.random.normal(ks[9], (mid,), f32) * 0.1
    wpw2 = jax.random.normal(ks[10], (out_ch, mid, 1, 1), f32) * 0.3
    bpw2 = jax.random.normal(ks[11], (out_ch,), f32) * 0.1
    g2 = 1.0 + 0.1 * jax.random.normal(ks[12], (out_ch,), f32)
    be2 = 0.1 * jax.random.normal(ks[13], (out_ch,), f32)
    rm2 = 0.1 * jax.random.normal(ks[14], (out_ch,), f32)
    rv2 = jnp.abs(jax.random.normal(ks[15], (out_ch,), f32)) + 0.5

    params = (wdw1, bdw1, wpw1, bpw1, g1, be1, rm1, rv1,
              wdw2, bdw2, wpw2, bpw2, g2, be2, rm2, rv2)

    x = jax.random.normal(ks[16], (N, C_in, H, W), f32)

    y_kernel = jax.block_until_ready(downds_forward(x, params))
    y_ref = jax.block_until_ready(downds_reference(x, params))

    assert y_kernel.shape == (N, out_ch, H // 2, W // 2), y_kernel.shape
    # all-f32 path: tight tolerance so fold/tap-ordering regressions are caught
    np.testing.assert_allclose(np.asarray(y_kernel), np.asarray(y_ref),
                               rtol=1e-4, atol=1e-5)
    print("KERNEL_OK")
</pallas_src>

<mosaic_0001>
module attributes {stable_mosaic.version = 11 : i64} {
  func.func @downds_kernel(%arg0: i32, %arg1: memref<1x4x8x128xf32, #tpu.memory_space<vmem>>, %arg2: memref<9x1x128xf32, #tpu.memory_space<vmem>>, %arg3: memref<8x72xf32, #tpu.memory_space<vmem>>, %arg4: memref<8x1xf32, #tpu.memory_space<vmem>>, %arg5: memref<8x72xf32, #tpu.memory_space<vmem>>, %arg6: memref<8x1xf32, #tpu.memory_space<vmem>>, %arg7: memref<1x8x128xf32, #tpu.memory_space<vmem>>) attributes {dimension_semantics = [#tpu.dimension_semantics<parallel>], iteration_bounds = array<i64: 2>, scalar_prefetch = 0 : i64, scratch_operands = 0 : i64, tpu.core_type = #tpu.core_type<tc>, window_params = [{transform_indices = @transform_0, window_bounds = array<i64: 1, 4, 8, 128>}, {pipeline_mode = #tpu.pipeline_mode<synchronous>, transform_indices = @transform_1, window_bounds = array<i64: 9, 1, 128>}, {pipeline_mode = #tpu.pipeline_mode<synchronous>, transform_indices = @transform_2, window_bounds = array<i64: 8, 72>}, {pipeline_mode = #tpu.pipeline_mode<synchronous>, transform_indices = @transform_3, window_bounds = array<i64: 8, 1>}, {pipeline_mode = #tpu.pipeline_mode<synchronous>, transform_indices = @transform_4, window_bounds = array<i64: 8, 72>}, {pipeline_mode = #tpu.pipeline_mode<synchronous>, transform_indices = @transform_5, window_bounds = array<i64: 8, 1>}, {transform_indices = @transform_6, window_bounds = array<i64: 1, 8, 128>}]} {
    %c0 = arith.constant 0 : index
    %c0_0 = arith.constant 0 : index
    %c0_1 = arith.constant 0 : index
    %c0_2 = arith.constant 0 : index
    %0 = vector.load %arg1[%c0, %c0_0, %c0_1, %c0_2] : memref<1x4x8x128xf32, #tpu.memory_space<vmem>>, vector<1x4x8x128xf32>
    %1 = vector.shape_cast %0 : vector<1x4x8x128xf32> to vector<4x8x128xf32>
    %2 = vector.extract_strided_slice %1 {offsets = [0, 0, 0], sizes = [1, 8, 128], strides = [1, 1, 1]} : vector<4x8x128xf32> to vector<1x8x128xf32>
    %3 = vector.shape_cast %2 : vector<1x8x128xf32> to vector<8x128xf32>
    %4 = vector.extract_strided_slice %1 {offsets = [1, 0, 0], sizes = [1, 8, 128], strides = [1, 1, 1]} : vector<4x8x128xf32> to vector<1x8x128xf32>
    %5 = vector.shape_cast %4 : vector<1x8x128xf32> to vector<8x128xf32>
    %6 = arith.maximumf %3, %5 : vector<8x128xf32>
    %7 = vector.extract_strided_slice %1 {offsets = [2, 0, 0], sizes = [1, 8, 128], strides = [1, 1, 1]} : vector<4x8x128xf32> to vector<1x8x128xf32>
    %8 = vector.shape_cast %7 : vector<1x8x128xf32> to vector<8x128xf32>
    %9 = vector.extract_strided_slice %1 {offsets = [3, 0, 0], sizes = [1, 8, 128], strides = [1, 1, 1]} : vector<4x8x128xf32> to vector<1x8x128xf32>
    %10 = vector.shape_cast %9 : vector<1x8x128xf32> to vector<8x128xf32>
    %11 = arith.maximumf %8, %10 : vector<8x128xf32>
    %12 = arith.maximumf %6, %11 : vector<8x128xf32>
    %c0_3 = arith.constant 0 : index
    %c0_4 = arith.constant 0 : index
    %c0_5 = arith.constant 0 : index
    %13 = vector.load %arg2[%c0_3, %c0_4, %c0_5] : memref<9x1x128xf32, #tpu.memory_space<vmem>>, vector<9x1x128xf32>
    %c0_6 = arith.constant 0 : index
    %c0_7 = arith.constant 0 : index
    %14 = vector.load %arg3[%c0_6, %c0_7] : memref<8x72xf32, #tpu.memory_space<vmem>>, vector<8x72xf32>
    %c0_8 = arith.constant 0 : index
    %c0_9 = arith.constant 0 : index
    %15 = vector.load %arg4[%c0_8, %c0_9] : memref<8x1xf32, #tpu.memory_space<vmem>>, vector<8x1xf32>
    %c9_i32 = arith.constant 9 : i32
    %16 = tpu.dynamic_rotate %12 by %c9_i32 dim 1 : vector<8x128xf32>, i32 -> vector<8x128xf32>
    %17 = vector.extract_strided_slice %13 {offsets = [0, 0, 0], sizes = [1, 1, 128], strides = [1, 1, 1]} : vector<9x1x128xf32> to vector<1x1x128xf32>
    %18 = vector.shape_cast %17 : vector<1x1x128xf32> to vector<1x128xf32>
    %19 = vector.broadcast %18 : vector<1x128xf32> to vector<8x128xf32>
    %20 = arith.mulf %16, %19 : vector<8x128xf32>
    %c8_i32 = arith.constant 8 : i32
    %21 = tpu.dynamic_rotate %12 by %c8_i32 dim 1 : vector<8x128xf32>, i32 -> vector<8x128xf32>
    %22 = vector.extract_strided_slice %13 {offsets = [1, 0, 0], sizes = [1, 1, 128], strides = [1, 1, 1]} : vector<9x1x128xf32> to vector<1x1x128xf32>
    %23 = vector.shape_cast %22 : vector<1x1x128xf32> to vector<1x128xf32>
    %24 = vector.broadcast %23 : vector<1x128xf32> to vector<8x128xf32>
    %25 = arith.mulf %21, %24 : vector<8x128xf32>
    %c7_i32 = arith.constant 7 : i32
    %26 = tpu.dynamic_rotate %12 by %c7_i32 dim 1 : vector<8x128xf32>, i32 -> vector<8x128xf32>
    %27 = vector.extract_strided_slice %13 {offsets = [2, 0, 0], sizes = [1, 1, 128], strides = [1, 1, 1]} : vector<9x1x128xf32> to vector<1x1x128xf32>
    %28 = vector.shape_cast %27 : vector<1x1x128xf32> to vector<1x128xf32>
    %29 = vector.broadcast %28 : vector<1x128xf32> to vector<8x128xf32>
    %30 = arith.mulf %26, %29 : vector<8x128xf32>
    %c1_i32 = arith.constant 1 : i32
    %31 = tpu.dynamic_rotate %12 by %c1_i32 dim 1 : vector<8x128xf32>, i32 -> vector<8x128xf32>
    %32 = vector.extract_strided_slice %13 {offsets = [3, 0, 0], sizes = [1, 1, 128], strides = [1, 1, 1]} : vector<9x1x128xf32> to vector<1x1x128xf32>
    %33 = vector.shape_cast %32 : vector<1x1x128xf32> to vector<1x128xf32>
    %34 = vector.broadcast %33 : vector<1x128xf32> to vector<8x128xf32>
    %35 = arith.mulf %31, %34 : vector<8x128xf32>
    %c127_i32 = arith.constant 127 : i32
    %36 = tpu.dynamic_rotate %12 by %c127_i32 dim 1 : vector<8x128xf32>, i32 -> vector<8x128xf32>
    %37 = vector.extract_strided_slice %13 {offsets = [5, 0, 0], sizes = [1, 1, 128], strides = [1, 1, 1]} : vector<9x1x128xf32> to vector<1x1x128xf32>
    %38 = vector.shape_cast %37 : vector<1x1x128xf32> to vector<1x128xf32>
    %39 = vector.broadcast %38 : vector<1x128xf32> to vector<8x128xf32>
    %40 = arith.mulf %36, %39 : vector<8x128xf32>
    %c121_i32 = arith.constant 121 : i32
    %41 = tpu.dynamic_rotate %12 by %c121_i32 dim 1 : vector<8x128xf32>, i32 -> vector<8x128xf32>
    %42 = vector.extract_strided_slice %13 {offsets = [6, 0, 0], sizes = [1, 1, 128], strides = [1, 1, 1]} : vector<9x1x128xf32> to vector<1x1x128xf32>
    %43 = vector.shape_cast %42 : vector<1x1x128xf32> to vector<1x128xf32>
    %44 = vector.broadcast %43 : vector<1x128xf32> to vector<8x128xf32>
    %45 = arith.mulf %41, %44 : vector<8x128xf32>
    %c120_i32 = arith.constant 120 : i32
    %46 = tpu.dynamic_rotate %12 by %c120_i32 dim 1 : vector<8x128xf32>, i32 -> vector<8x128xf32>
    %47 = vector.extract_strided_slice %13 {offsets = [7, 0, 0], sizes = [1, 1, 128], strides = [1, 1, 1]} : vector<9x1x128xf32> to vector<1x1x128xf32>
    %48 = vector.shape_cast %47 : vector<1x1x128xf32> to vector<1x128xf32>
    %49 = vector.broadcast %48 : vector<1x128xf32> to vector<8x128xf32>
    %50 = arith.mulf %46, %49 : vector<8x128xf32>
    %c119_i32 = arith.constant 119 : i32
    %51 = tpu.dynamic_rotate %12 by %c119_i32 dim 1 : vector<8x128xf32>, i32 -> vector<8x128xf32>
    %52 = vector.extract_strided_slice %13 {offsets = [8, 0, 0], sizes = [1, 1, 128], strides = [1, 1, 1]} : vector<9x1x128xf32> to vector<1x1x128xf32>
    %53 = vector.shape_cast %52 : vector<1x1x128xf32> to vector<1x128xf32>
    %54 = vector.broadcast %53 : vector<1x128xf32> to vector<8x128xf32>
    %55 = arith.mulf %51, %54 : vector<8x128xf32>
    %56 = tpu.concatenate %20, %25, %30, %35, %12, %40, %45, %50, %55 in 0 : vector<8x128xf32>, vector<8x128xf32>, vector<8x128xf32>, vector<8x128xf32>, vector<8x128xf32>, vector<8x128xf32>, vector<8x128xf32>, vector<8x128xf32>, vector<8x128xf32> -> vector<72x128xf32>
    %cst = arith.constant dense<0.000000e+00> : vector<8x128xf32>
    %57 = tpu.matmul %14, %56, %cst {dimension_numbers = #tpu.dot_dimension_numbers<[1], [0], [0], [1], [0, 0, 1, 1], [], []>} : vector<8x72xf32>, vector<72x128xf32>, vector<8x128xf32> -> vector<8x128xf32>
    %58 = vector.broadcast %15 : vector<8x1xf32> to vector<8x128xf32>
    %59 = arith.addf %57, %58 : vector<8x128xf32>
    %cst_10 = arith.constant 0.000000e+00 : f32
    %60 = vector.broadcast %cst_10 : f32 to vector<8x128xf32>
    %61 = arith.maximumf %59, %60 : vector<8x128xf32>
    %c0_11 = arith.constant 0 : index
    %c0_12 = arith.constant 0 : index
    %62 = vector.load %arg5[%c0_11, %c0_12] : memref<8x72xf32, #tpu.memory_space<vmem>>, vector<8x72xf32>
    %c0_13 = arith.constant 0 : index
    %c0_14 = arith.constant 0 : index
    %63 = vector.load %arg6[%c0_13, %c0_14] : memref<8x1xf32, #tpu.memory_space<vmem>>, vector<8x1xf32>
    %c9_i32_15 = arith.constant 9 : i32
    %64 = tpu.dynamic_rotate %61 by %c9_i32_15 dim 1 : vector<8x128xf32>, i32 -> vector<8x128xf32>
    %65 = vector.extract_strided_slice %13 {offsets = [0, 0, 0], sizes = [1, 1, 128], strides = [1, 1, 1]} : vector<9x1x128xf32> to vector<1x1x128xf32>
    %66 = vector.shape_cast %65 : vector<1x1x128xf32> to vector<1x128xf32>
    %67 = vector.broadcast %66 : vector<1x128xf32> to vector<8x128xf32>
    %68 = arith.mulf %64, %67 : vector<8x128xf32>
    %c8_i32_16 = arith.constant 8 : i32
    %69 = tpu.dynamic_rotate %61 by %c8_i32_16 dim 1 : vector<8x128xf32>, i32 -> vector<8x128xf32>
    %70 = vector.extract_strided_slice %13 {offsets = [1, 0, 0], sizes = [1, 1, 128], strides = [1, 1, 1]} : vector<9x1x128xf32> to vector<1x1x128xf32>
    %71 = vector.shape_cast %70 : vector<1x1x128xf32> to vector<1x128xf32>
    %72 = vector.broadcast %71 : vector<1x128xf32> to vector<8x128xf32>
    %73 = arith.mulf %69, %72 : vector<8x128xf32>
    %c7_i32_17 = arith.constant 7 : i32
    %74 = tpu.dynamic_rotate %61 by %c7_i32_17 dim 1 : vector<8x128xf32>, i32 -> vector<8x128xf32>
    %75 = vector.extract_strided_slice %13 {offsets = [2, 0, 0], sizes = [1, 1, 128], strides = [1, 1, 1]} : vector<9x1x128xf32> to vector<1x1x128xf32>
    %76 = vector.shape_cast %75 : vector<1x1x128xf32> to vector<1x128xf32>
    %77 = vector.broadcast %76 : vector<1x128xf32> to vector<8x128xf32>
    %78 = arith.mulf %74, %77 : vector<8x128xf32>
    %c1_i32_18 = arith.constant 1 : i32
    %79 = tpu.dynamic_rotate %61 by %c1_i32_18 dim 1 : vector<8x128xf32>, i32 -> vector<8x128xf32>
    %80 = vector.extract_strided_slice %13 {offsets = [3, 0, 0], sizes = [1, 1, 128], strides = [1, 1, 1]} : vector<9x1x128xf32> to vector<1x1x128xf32>
    %81 = vector.shape_cast %80 : vector<1x1x128xf32> to vector<1x128xf32>
    %82 = vector.broadcast %81 : vector<1x128xf32> to vector<8x128xf32>
    %83 = arith.mulf %79, %82 : vector<8x128xf32>
    %c127_i32_19 = arith.constant 127 : i32
    %84 = tpu.dynamic_rotate %61 by %c127_i32_19 dim 1 : vector<8x128xf32>, i32 -> vector<8x128xf32>
    %85 = vector.extract_strided_slice %13 {offsets = [5, 0, 0], sizes = [1, 1, 128], strides = [1, 1, 1]} : vector<9x1x128xf32> to vector<1x1x128xf32>
    %86 = vector.shape_cast %85 : vector<1x1x128xf32> to vector<1x128xf32>
    %87 = vector.broadcast %86 : vector<1x128xf32> to vector<8x128xf32>
    %88 = arith.mulf %84, %87 : vector<8x128xf32>
    %c121_i32_20 = arith.constant 121 : i32
    %89 = tpu.dynamic_rotate %61 by %c121_i32_20 dim 1 : vector<8x128xf32>, i32 -> vector<8x128xf32>
    %90 = vector.extract_strided_slice %13 {offsets = [6, 0, 0], sizes = [1, 1, 128], strides = [1, 1, 1]} : vector<9x1x128xf32> to vector<1x1x128xf32>
    %91 = vector.shape_cast %90 : vector<1x1x128xf32> to vector<1x128xf32>
    %92 = vector.broadcast %91 : vector<1x128xf32> to vector<8x128xf32>
    %93 = arith.mulf %89, %92 : vector<8x128xf32>
    %c120_i32_21 = arith.constant 120 : i32
    %94 = tpu.dynamic_rotate %61 by %c120_i32_21 dim 1 : vector<8x128xf32>, i32 -> vector<8x128xf32>
    %95 = vector.extract_strided_slice %13 {offsets = [7, 0, 0], sizes = [1, 1, 128], strides = [1, 1, 1]} : vector<9x1x128xf32> to vector<1x1x128xf32>
    %96 = vector.shape_cast %95 : vector<1x1x128xf32> to vector<1x128xf32>
    %97 = vector.broadcast %96 : vector<1x128xf32> to vector<8x128xf32>
    %98 = arith.mulf %94, %97 : vector<8x128xf32>
    %c119_i32_22 = arith.constant 119 : i32
    %99 = tpu.dynamic_rotate %61 by %c119_i32_22 dim 1 : vector<8x128xf32>, i32 -> vector<8x128xf32>
    %100 = vector.extract_strided_slice %13 {offsets = [8, 0, 0], sizes = [1, 1, 128], strides = [1, 1, 1]} : vector<9x1x128xf32> to vector<1x1x128xf32>
    %101 = vector.shape_cast %100 : vector<1x1x128xf32> to vector<1x128xf32>
    %102 = vector.broadcast %101 : vector<1x128xf32> to vector<8x128xf32>
    %103 = arith.mulf %99, %102 : vector<8x128xf32>
    %104 = tpu.concatenate %68, %73, %78, %83, %61, %88, %93, %98, %103 in 0 : vector<8x128xf32>, vector<8x128xf32>, vector<8x128xf32>, vector<8x128xf32>, vector<8x128xf32>, vector<8x128xf32>, vector<8x128xf32>, vector<8x128xf32>, vector<8x128xf32> -> vector<72x128xf32>
    %cst_23 = arith.constant dense<0.000000e+00> : vector<8x128xf32>
    %105 = tpu.matmul %62, %104, %cst_23 {dimension_numbers = #tpu.dot_dimension_numbers<[1], [0], [0], [1], [0, 0, 1, 1], [], []>} : vector<8x72xf32>, vector<72x128xf32>, vector<8x128xf32> -> vector<8x128xf32>
    %106 = vector.broadcast %63 : vector<8x1xf32> to vector<8x128xf32>
    %107 = arith.addf %105, %106 : vector<8x128xf32>
    %cst_24 = arith.constant 0.000000e+00 : f32
    %108 = vector.broadcast %cst_24 : f32 to vector<8x128xf32>
    %109 = arith.maximumf %107, %108 : vector<8x128xf32>
    %c0_25 = arith.constant 0 : index
    %c0_26 = arith.constant 0 : index
    %c0_27 = arith.constant 0 : index
    %110 = vector.load %arg7[%c0_25, %c0_26, %c0_27] : memref<1x8x128xf32, #tpu.memory_space<vmem>>, vector<1x8x128xf32>
    %111 = vector.shape_cast %110 : vector<1x8x128xf32> to vector<8x128xf32>
    %112 = vector.shape_cast %109 : vector<8x128xf32> to vector<1x8x128xf32>
    tpu.vector_store %arg7[%c0_25, %c0_26, %c0_27], %112 {strides = array<i32>} : memref<1x8x128xf32, #tpu.memory_space<vmem>>, vector<1x8x128xf32>,
    return
  }
  func.func @transform_0(%arg0: i32) -> (i32, i32, i32, i32) {
    %c0_i32 = arith.constant 0 : i32
    %c0_i32_0 = arith.constant 0 : i32
    %c0_i32_1 = arith.constant 0 : i32
    %c0_i32_2 = arith.constant 0 : i32
    return %arg0, %c0_i32, %c0_i32_0, %c0_i32_1 : i32, i32, i32, i32
  }
  func.func @transform_1(%arg0: i32) -> (i32, i32, i32) {
    %c0_i32 = arith.constant 0 : i32
    %c0_i32_0 = arith.constant 0 : i32
    %c0_i32_1 = arith.constant 0 : i32
    %c0_i32_2 = arith.constant 0 : i32
    return %c0_i32, %c0_i32_0, %c0_i32_1 : i32, i32, i32
  }
  func.func @transform_2(%arg0: i32) -> (i32, i32) {
    %c0_i32 = arith.constant 0 : i32
    %c0_i32_0 = arith.constant 0 : i32
    %c0_i32_1 = arith.constant 0 : i32
    return %c0_i32, %c0_i32_0 : i32, i32
  }
  func.func @transform_3(%arg0: i32) -> (i32, i32) {
    %c0_i32 = arith.constant 0 : i32
    %c0_i32_0 = arith.constant 0 : i32
    %c0_i32_1 = arith.constant 0 : i32
    return %c0_i32, %c0_i32_0 : i32, i32
  }
  func.func @transform_4(%arg0: i32) -> (i32, i32) {
    %c0_i32 = arith.constant 0 : i32
    %c0_i32_0 = arith.constant 0 : i32
    %c0_i32_1 = arith.constant 0 : i32
    return %c0_i32, %c0_i32_0 : i32, i32
  }
  func.func @transform_5(%arg0: i32) -> (i32, i32) {
    %c0_i32 = arith.constant 0 : i32
    %c0_i32_0 = arith.constant 0 : i32
    %c0_i32_1 = arith.constant 0 : i32
    return %c0_i32, %c0_i32_0 : i32, i32
  }
  func.func @transform_6(%arg0: i32) -> (i32, i32, i32) {
    %c0_i32 = arith.constant 0 : i32
    %c0_i32_0 = arith.constant 0 : i32
    %c0_i32_1 = arith.constant 0 : i32
    return %arg0, %c0_i32, %c0_i32_0 : i32, i32, i32
  }
}

</mosaic_0001>

<bundles_post_ra>
// kernel: tpu_custom_call.1
= control target key start
LH: loop header
LB: loop body
LE: loop exit
PB: predicated region body
PF: predicated region fallthrough
CT: control target
= control target key end

     0   :  { %11 = vsyncpa [#allocation3], 0  ;;  %s1176_s0 = inlined_call_operand.hbm [shape: f32[2,4,8,128], index: 0, kind: input, shape index: {}]   ;;  %s1177_s1 = inlined_call_operand.vmem [shape: f32[9,1,128], index: 1, kind: input, shape index: {}]   ;;  %s1178_s2 = inlined_call_operand.vmem [shape: f32[8,72], index: 2, kind: input, shape index: {}]   ;;  %s1179_s3 = inlined_call_operand.vmem [shape: f32[8,1], index: 3, kind: input, shape index: {}]   ;;  %s1180_s4 = inlined_call_operand.vmem [shape: f32[8,72], index: 4, kind: input, shape index: {}]   ;;  %s1181_s5 = inlined_call_operand.vmem [shape: f32[8,1], index: 5, kind: input, shape index: {}]   ;;  %s1182_s6 = inlined_call_operand.hbm [shape: f32[2,8,128], index: 6, kind: output, shape index: {}]  }
   0x1   :  { %13 = vsyncpa [#allocation3 + $0x1], 0 }
   0x2   :  { %14 = vsyncpa [#allocation4], 0 }
   0x3   :  { %16 = vsyncpa [#allocation4 + $0x1], 0  ;;  %s949_s21 = smov 0   ;;  %s951_s22 = smov 0  }
   0x4   :  { %s953_s23 = smov 0   ;;  %s955_s24 = smov 0  }
   0x5 LB: > { %s970_s25 = sadd.s32 4294967295, %s896_s24   ;;  %s629_s26 = sadd.s32 4294967294, %s896_s24   ;;  %s896_s24 = sphi %s955_s24, %s1203_s24   ;;  %s892_s23 = sphi %s953_s23, %s1202_s23   ;;  %s888_s22 = sphi %s951_s22, %s1201_s22   ;;  %s884_s21 = sphi %s949_s21, %s1200_s21  }
   0x6   : > { %s974_s27 = sadd.s32 1, %s896_s24   ;;  %s29_s28 = sadd.s32 1, %s892_s23 }
   0x7   : > { %s26_s29 = ssub.s32 %s896_s24, %s974_s27  ;;  %p36_p0 = scmp.ne.s32.totalorder %s892_s23, %s888_s22 }
   0x8   : > { %p27_p1 = scmp.eq.s32.totalorder %s26_s29, 0  ;;  %p37_p2 = scmp.eq.s32.totalorder %s896_s24, 0 }
   0x9   : > { %p42_p3 = scmp.ne.s32.totalorder %s888_s22, %s884_s21  ;;  %p43_p4 = scmp.eq.s32.totalorder %s970_s25, 0 }
   0xa   : > { %s986_s30 = scalar_select %p27_p1, %s892_s23, %s29_s28  }
   0xb   : > { %p988_p5 = por %p37_p2, %p36_p0  ;;  %p992_p6 = por %p43_p4, %p42_p3 }
   0xc   : > { %p171_p7 = scmp.eq.s32.totalorder %s970_s25, 1  ;;  %p177_p8 = scmp.eq.s32.totalorder %s629_s26, 1 }
   0xd   : > { %p751_p10 = scmp.lt.s32.totalorder %s896_s24, 2  ;;  %s212_s11 = sand.u32 1, %s892_s23  }
   0xe   : > { %p999_p11 = por %p171_p7, %p36_p0  ;;  %p1003_p12 = por %p177_p8, %p42_p3 }
   0xf   : > { %s652_s12 = sshll.u32 %s896_s24, 9  ;;  %s632_s13 = sshll.u32 %s212_s11, 5 }
  0x10   : > { %s1190_s9 = scalar_select %p999_p11, 1, 0 }
  0x11   : > { %s1191_s10 = scalar_select %p1003_p12, 1, 0 }
  0x12   : > { %s1012_s16 = scalar_lea.hbm %s1176_s0, %s652_s12  ;;  %s216_s17 = scalar_lea.vmem [#allocation2], %s632_s13 }
  0x13   : > { %s223_s18 = sshll.u32 %s216_s17, 4  ;;  %p1016_p13 = pnand %p751_p10, %p988_p5  ;;  %s1020_s18 = int_to_ptr.vmem [resolvable:$true] %s223_s18 }
  0x14   : > { %s1022_s20 = scalar_lea.sflag [#allocation3], %s212_s11  ;;  %s800_s26 = scalar_lea.hbm %s1012_s16, 512 }
  0x15   : > { %p801_p0 = scmp.ne.s32.totalorder %s1012_s16, %s800_s26  ;;  %p802_p1 = pneg %p1016_p13 }
  0x16   : > { %s805_s7 = scalar_lea.hbm %s1176_s0, 1024  ;;  %p806_p4 = scmp.lt.u32.totalorder %s1012_s16, %s1176_s0 }
  0x17   : > { %p803_p2 = pnand %p802_p1, %p801_p0  ;;  %p807_p5 = scmp.lt.u32.totalorder %s805_s7, %s800_s26 }
  0x18   : > { %p809_p8 = scmp.lt.u32.totalorder %s800_s26, %s1012_s16 }
  0x19   : > { %p804_p3 = pneg %p803_p2  ;;  %p808_p7 = por %p807_p5, %p806_p4 }
  0x1b   : > { %p810_p10 = por %p809_p8, %p808_p7 }
  0x1d   : > { %p811_p9 = pnand %p810_p10, %p804_p3 }
  0x1f   : > { %814 = shalt.err (!%p811_p9)
}
  0x20   : > { %s815_s11 = scalar_lea.vmem %s1020_s18, 512  ;;  %s898_s14 = smov [#allocation2]  }
  0x21   : > { %p816_p0 = scmp.ne.s32.totalorder %s1020_s18, %s815_s11  ;;  %s820_s15 = sshll.u32 %s898_s14, 4  ;;  %s821_s15 = int_to_ptr.vmem [resolvable:$false] %s820_s15 }
  0x22   : > { %s822_s17 = scalar_lea.vmem %s821_s15, 1024  ;;  %p823_p11 = scmp.lt.s32.totalorder %s1020_s18, %s821_s15 }
  0x23   : > { %p818_p2 = pnand %p816_p0, %p802_p1  ;;  %p824_p4 = scmp.lt.s32.totalorder %s822_s17, %s815_s11 }
  0x25   : > { %p819_p12 = pneg %p818_p2  ;;  %p825_p5 = por %p824_p4, %p823_p11 }
  0x27   : > { %p826_p7 = pnand %p825_p5, %p819_p12 }
  0x29   : > { %829 = shalt.err (!%p826_p7)
}
  0x2a   : > { %s899_s26 = smov 128   ;;  %s900_s28 = smov 8  }
  0x2b   : > { %746 = dma.hbm_to_vmem [thread:$0]  (!%p1016_p13), %s1012_s16, 512, %s1020_s18, %s1022_s20, %s899_s26, %s899_s26, %s900_s28  }
  0x2c   : > { %p635_p9 = scmp.ge.s32.totalorder %s896_s24, 1  ;;  %p231_p1 = scmp.lt.s32.totalorder %s896_s24, 3 }
  0x2e   : > { %p232_p3 = pnand %p635_p9, %p231_p1 }
  0x2f   : > { %s1053_s29 = sand.u32 (!%p232_p3), 1, %s888_s22  }
  0x30   : > { %235 = sbr.rel (%p232_p3) target bundleno = 788 (0x314), region = 44  ;;  %s636_s7 = sshll.u32 (!%p232_p3), %s1053_s29, 5 }
  0x31   : > { %s238_s12 = scalar_lea.sflag (!%p232_p3), [#allocation3], %s1053_s29  ;;  %s241_s13 = scalar_lea.vmem (!%p232_p3), [#allocation2], %s636_s7 }
  0x37   : > { %875 = dma.done.wait (%p992_p6), %s238_s12, 512  }
  0x38   : > { %877 = vsyncadd (%p992_p6), %s238_s12, 4294966784  ;;  %v270_v0 = vld [vmem:[%s241_s13] sm:$0xff]  ;;  %v271_v1 = vld [vmem:[%s241_s13 + $0x8] sm:$0xff]  ;;  %v901_v3 = vmov 0.0|0.0   ;;  %s902_s16 = smov 7   ;;  %s903_s18 = smov 9  }
  0x39   : > { %v272_v2 = vld [vmem:[%s241_s13 + $0x10] sm:$0xff]  ;;  %715 = vmatprep.subr.bf16.mxu0 %v901_v3  ;;  %727 = vmatprep.subr.bf16.mxu1 %v901_v3  ;;  %v273_v4 = vld [vmem:[%s241_s13 + $0x18] sm:$0xff]  ;;  %v274_v5 = vmax.f32 %v270_v0, %v271_v1  ;;  %s1185_s8 = smov 1   ;;  %s905_s19 = smov 8   ;;  %vm908_vm0 = vmmov 0   ;;  %v909_v8 = vmov 0.0  }
  0x3a   : > { %v275_v6 = vmax.f32 %v272_v2, %v273_v4  ;;  %s906_s20 = smov 127   ;;  %s1184_s11 = smov 121   ;;  %691 = vmatprep.mubr.msk.f32.mxu0 %vm908_vm0, %v909_v8  ;;  %712 = vmatprep.mubr.msk.f32.mxu1 %vm908_vm0, %v909_v8  ;;  %v912_v9 = vmov 0   ;;  %v286_v10 = vld [vmem:[%s1179_s3] sm:$0xff]  ;;  %v645_v36 = vld [vmem:[%s1177_s1 + $0x8] ss:$0 sm:$0xff] }
  0x3b   : > { %s1187_s14 = smov 120   ;;  %s1186_s15 = smov 119   ;;  %799 = vset.pattern.permute.xlu0 %v912_v9  ;;  %v638_v13 = vld [vmem:[%s1177_s1] ss:$0 sm:$0xff]  ;;  %v639_v14 = vld [vmem:[%s1177_s1 + $0x1] ss:$0 sm:$0xff] }
  0x3c   : > { %v276_v7 = vmax.f32 %v274_v5, %v275_v6  ;;  %v640_v15 = vld [vmem:[%s1177_s1 + $0x2] ss:$0 sm:$0xff]  ;;  %v641_v16 = vld [vmem:[%s1177_s1 + $0x3] ss:$0 sm:$0xff]  ;;  %v642_v21 = vld [vmem:[%s1177_s1 + $0x5] ss:$0 sm:$0xff] }
  0x3d   : > { %v643_v27 = vld [vmem:[%s1177_s1 + $0x6] ss:$0 sm:$0xff]  ;;  %v644_v29 = vld [vmem:[%s1177_s1 + $0x7] ss:$0 sm:$0xff]  ;;  %vm364_vm1 = vcmask 588800   ;;  %s1193_s17 = smov 120  }
  0x3e   : > { %305 = vrot.lane.b32.xlu1 %v276_v7, %s902_s16  ;;  %287 = vrot.lane.b32.xlu0 %v276_v7, %s903_s18  ;;  %v285_v39 = vld [vmem:[%s1178_s2] sm:$0xff]  ;;  %s1194_s26 = smov 1   ;;  %p1197_p11 = scmp.ne.s32.totalorder %s1190_s9, 0 }
  0x3f   : > { %v440_v45 = vld [vmem:[%s1181_s5] sm:$0xff] }
  0x40   : > { %v439_v2 = vld [vmem:[%s1180_s4] sm:$0xff] }
  0x42   : > { %314 = vrot.lane.b32.xlu1 %v276_v7, %s1185_s8  ;;  %296 = vrot.lane.b32.xlu0 %v276_v7, %s905_s19 }
  0x46   : > { %323 = vrot.lane.b32.xlu0 %v276_v7, %s906_s20  ;;  %332 = vrot.lane.b32.xlu1 %v276_v7, %s1184_s11 }
  0x4a   : > { %341 = vrot.lane.b32.xlu0 %v276_v7, %s1187_s14  ;;  %350 = vrot.lane.b32.xlu1 %v276_v7, %s1186_s15  ;;  %s1195_s14 = smov 121   ;;  %s1196_s15 = smov 119  }
  0x4e   : > { %361 = vperm.xlu0 %799, %v286_v10  }
  0xb0   : > { %v306_v11 = vpop.permute.xlu1 %305  ;;  %v288_v12 = vpop.permute.xlu0 %287 }
  0xb1   : > { %v295_v19 = vmul.f32 %v638_v13, %v288_v12  ;;  %v313_v22 = vmul.f32 %v640_v15, %v306_v11 }
  0xb4   : > { %v315_v17 = vpop.permute.xlu1 %314  ;;  %v297_v18 = vpop.permute.xlu0 %296 }
  0xb5   : > { %v304_v20 = vmul.f32 %v639_v14, %v297_v18  ;;  %v322_v23 = vmul.f32 %v641_v16, %v315_v17 }
  0xb7   : > { %v716_v24 = vpack.c.bf16 %v304_v20, %v295_v19  ;;  %v719_v30 = vpack.c.bf16 %v322_v23, %v313_v22 }
  0xb8   : > { %v324_v25 = vpop.permute.xlu0 %323  ;;  %v333_v28 = vpop.permute.xlu1 %332 }
  0xb9   : > { %717 = vmatpush3.bf16.msra.mxu0 %v716_v24  ;;  %v331_v26 = vmul.f32 %v642_v21, %v324_v25  ;;  %v340_v33 = vmul.f32 %v643_v27, %v333_v28 }
  0xba   : > { %718 = vmatprep.subr.bf16.mxu0 %v901_v3 }
  0xbb   : > { %v722_v32 = vpack.c.bf16 %v331_v26, %v276_v7 }
  0xbc   : > { %v342_v31 = vpop.permute.xlu0 %341  ;;  %v351_v37 = vpop.permute.xlu1 %350 }
  0xbd   : > { %720 = vmatpush3.bf16.msra.mxu0 %v719_v30  ;;  %v349_v34 = vmul.f32 %v644_v29, %v342_v31  ;;  %v358_v38 = vmul.f32 %v645_v36, %v351_v37 }
  0xbe   : > { %721 = vmatprep.subr.bf16.mxu0 %v901_v3 }
  0xbf   : > { %v725_v35 = vpack.c.bf16 %v349_v34, %v340_v33 }
  0xc1   : > { %723 = vmatpush3.bf16.msra.mxu0 %v722_v32 }
  0xc2   : > { %724 = vmatprep.subr.bf16.mxu0 %v901_v3 }
  0xc5   : > { %726 = vmatpush3.bf16.msra.mxu0 %v725_v35 }
  0xc6   : > { %689 = vmatprep.subr.mxu0 %v909_v8 }
  0xc9   : > { %690 = vmatpush3.msra.mxu0 %v358_v38 }
  0xca   : > { %692 = vmatmul.mubr.msk.f32.vlgmr.msra.gmra.mrb[0].mxu0 %vm364_vm1, %v285_v39 }
  0xcd   : > { %v362_v40 = vpop.permute.xlu0 %361 }
 0x19d   : > { %v434_v41 = vpop.f32.mrb[0].mxu0 }
 0x19e   : > { %v435_v42 = vadd.f32 %v434_v41, %v362_v40  ;;  %v693_v43 = vpop.f32.mrb[1].mxu0 }
 0x1a0   : > { %v438_v44 = vmax.f32 %v435_v42, 0.0 }
 0x1a2   : > { %447 = vrot.lane.b32.xlu0 %v438_v44, %s902_s16  ;;  %441 = vrot.lane.b32.xlu1 %v438_v44, %s903_s18 }
 0x1a6   : > { %453 = vrot.lane.b32.xlu0 %v438_v44, %s906_s20  ;;  %444 = vrot.lane.b32.xlu1 %v438_v44, %s905_s19  ;;  %s637_s19 = sshll.u32 %s1053_s29, 3  ;;  %s649_s20 = sshll.u32 %s970_s25, 7 }
 0x1a7   : > { %s269_s28 = scalar_lea.vmem [#allocation5], %s637_s19  ;;  %s913_s25 = smov [#allocation5]  }
 0x1a8   : > { %s559_s7 = sshll.u32 %s269_s28, 4  ;;  %s834_s11 = sshll.u32 %s913_s25, 4  ;;  %s1134_s7 = int_to_ptr.vmem [resolvable:$true] %s559_s7  ;;  %s835_s11 = int_to_ptr.vmem [resolvable:$false] %s834_s11 }
 0x1a9   : > { %s830_s8 = scalar_lea.vmem %s1134_s7, 128  ;;  %p837_p8 = scmp.lt.s32.totalorder %s1134_s7, %s835_s11 }
 0x1aa   : > { %459 = vrot.lane.b32.xlu0 %v438_v44, %s1193_s17  ;;  %450 = vrot.lane.b32.xlu1 %v438_v44, %s1194_s26  ;;  %s1132_s17 = scalar_lea.hbm %s1182_s6, %s649_s20  ;;  %s546_s26 = scalar_lea.sflag [#allocation4], %s1053_s29 }
 0x1ab   : > { %p831_p6 = scmp.ne.s32.totalorder %s1134_s7, %s830_s8 }
 0x1ad   : > { %p832_p12 = pnand %p831_p6, %p1197_p11 }
 0x1ae   : > { %467 = vperm.xlu0 %799, %v440_v45   ;;  %456 = vrot.lane.b32.xlu1 %v438_v44, %s1195_s14  ;;  %s836_s14 = scalar_lea.vmem %s835_s11, 256 }
 0x1af   : > { %p833_p13 = pneg %p832_p12  ;;  %p838_p10 = scmp.lt.s32.totalorder %s836_s14, %s830_s8 }
 0x1b1   : > { %p839_p0 = por %p838_p10, %p837_p8 }
 0x1b2   : > { %462 = vrot.lane.b32.xlu1 %v438_v44, %s1196_s15 }
 0x1b3   : > { %p840_p2 = pnand %p839_p0, %p833_p13 }
 0x214   : > { %v442_v46 = vpop.permute.xlu1 %441  ;;  %v448_v47 = vpop.permute.xlu0 %447 }
 0x215   : > { %v443_v49 = vmul.f32 %v638_v13, %v442_v46  ;;  %v449_v54 = vmul.f32 %v640_v15, %v448_v47 }
 0x218   : > { %v445_v48 = vpop.permute.xlu1 %444  ;;  %v454_v52 = vpop.permute.xlu0 %453 }
 0x219   : > { %v446_v50 = vmul.f32 %v639_v14, %v445_v48  ;;  %v455_v56 = vmul.f32 %v642_v21, %v454_v52 }
 0x21b   : > { %v728_v51 = vpack.c.bf16 %v446_v50, %v443_v49  ;;  %v734_v60 = vpack.c.bf16 %v455_v56, %v438_v44 }
 0x21c   : > { %v451_v53 = vpop.permute.xlu1 %450  ;;  %v460_v59 = vpop.permute.xlu0 %459 }
 0x21d   : > { %v452_v55 = vmul.f32 %v641_v16, %v451_v53  ;;  %729 = vmatpush3.bf16.msra.mxu1 %v728_v51  ;;  %v461_v62 = vmul.f32 %v644_v29, %v460_v59 }
 0x21e   : > { %730 = vmatprep.subr.bf16.mxu1 %v901_v3 }
 0x21f   : > { %v731_v57 = vpack.c.bf16 %v452_v55, %v449_v54 }
 0x220   : > { %v457_v58 = vpop.permute.xlu1 %456 }
 0x221   : > { %732 = vmatpush3.bf16.msra.mxu1 %v731_v57  ;;  %v458_v61 = vmul.f32 %v643_v27, %v457_v58 }
 0x222   : > { %733 = vmatprep.subr.bf16.mxu1 %v901_v3 }
 0x223   : > { %v737_v63 = vpack.c.bf16 %v461_v62, %v458_v61 }
 0x224   : > { %v463_v0 = vpop.permute.xlu1 %462 }
 0x225   : > { %735 = vmatpush3.bf16.msra.mxu1 %v734_v60  ;;  %v464_v1 = vmul.f32 %v645_v36, %v463_v0 }
 0x226   : > { %736 = vmatprep.subr.bf16.mxu1 %v901_v3 }
 0x229   : > { %738 = vmatpush3.bf16.msra.mxu1 %v737_v63 }
 0x22a   : > { %710 = vmatprep.subr.mxu1 %v909_v8 }
 0x22d   : > { %711 = vmatpush3.msra.mxu1 %v464_v1  ;;  %v468_v4 = vpop.permute.xlu0 %467 }
 0x22e   : > { %713 = vmatmul.mubr.msk.f32.vlgmr.msra.gmra.mrb[0].mxu1 %vm364_vm1, %v439_v2 }
 0x301   : > { %v539_v5 = vpop.f32.mrb[0].mxu1 }
 0x302   : > { %v540_v3 = vadd.f32 %v539_v5, %v468_v4  ;;  %v714_v6 = vpop.f32.mrb[1].mxu1 }
 0x304   : > { %v543_v7 = vmax.f32 %v540_v3, 0.0 }
 0x306   : > { %544 = vst [vmem:[%s269_s28] sm:$0xff] %v543_v7 }
 0x307   : > { %843 = shalt.err (!%p840_p2)
}
 0x308   : > { %s844_s29 = scalar_lea.hbm %s1132_s17, 128  ;;  %s848_s18 = scalar_lea.hbm %s1182_s6, 256 }
 0x309   : > { %p845_p4 = scmp.ne.s32.totalorder %s1132_s17, %s844_s29  ;;  %p849_p9 = scmp.lt.u32.totalorder %s1132_s17, %s1182_s6 }
 0x30a   : > { %p850_p1 = scmp.lt.u32.totalorder %s848_s18, %s844_s29  ;;  %p852_p6 = scmp.lt.u32.totalorder %s844_s29, %s1132_s17 }
 0x30b   : > { %p846_p5 = pnand %p845_p4, %p1197_p11 }
 0x30c   : > { %p851_p3 = por %p850_p1, %p849_p9 }
 0x30d   : > { %p847_p7 = pneg %p846_p5 }
 0x30e   : > { %p853_p12 = por %p852_p6, %p851_p3 }
 0x310   : > { %p854_p13 = pnand %p853_p12, %p847_p7 }
 0x312   : > { %857 = shalt.err (!%p854_p13)
}
 0x313   : > { %741 = dma.vmem_to_hbm [thread:$0]  (%p1197_p11), %s1134_s7, 128, %s1132_s17, %s546_s26  }
 0x314 PF: > { %s571_s28 = sand.u32 1, %s884_s21   ;;  %p1198_p8 = scmp.ne.s32.totalorder %s1191_s10, 0 }
 0x315   : > { %p1199_p10 = scmp.ge.s32.totalorder %s896_s24, 2  ;;  %s572_s12 = scalar_lea.sflag [#allocation4], %s571_s28 }
 0x317   : > { %p748_p0 = pnand %p1199_p10, %p1198_p8 }
 0x319   : > { %879 = dma.done.wait (!%p748_p0), %s572_s12, 128  }
 0x31a   : > { %881 = vsyncadd (!%p748_p0), %s572_s12, 4294967168  ;;  %p19_p2 = scmp.ge.s32.totalorder %s974_s27, 4   ;;  %s1200_s21 = smov %s888_s22 }
 0x31b   : > { %s1201_s22 = smov %s892_s23  ;;  %s1202_s23 = smov %s986_s30 }
 0x31c   : > { %s1203_s24 = smov %s974_s27  ;;  %21 = sbr.rel (!%p19_p2) target bundleno = 5 (0x5), region = 89 }
 0x323   :  { %577 = vsyncpa [#allocation3], 1 }
 0x324   :  { %579 = vsyncpa [#allocation3 + $0x1], 1 }
 0x325   :  { %580 = vsyncpa [#allocation4], 1 }
 0x326   :  { %582 = vsyncpa [#allocation4 + $0x1], 1 }

</bundles_post_ra>
